<compile_context>
chip_gen: v7x
topology: tpu7x:2x2x1
jax: 0.10.0
libtpu: 0.0.40
codegen_flags: <defaults>
</compile_context>

<pallas_src>
import functools
import math
import numpy as np
import jax
import jax.numpy as jnp
from jax.experimental import pallas as pl
from jax.experimental.pallas import tpu as pltpu


def _eca_kernel_size(channel, b=1, gamma=2):
    k = int(abs((math.log(channel, 2) + b) / gamma))
    return k if k % 2 else k + 1


# ---------------------------- Pallas kernel ----------------------------

def pspglp_kernel(params_ref, x_ref, feat_ref, out_ref, *, ksz):
    # params_ref: SMEM (ksz+1,)  [conv_w[0..ksz-1], logit_scale_exp]  (scalar prefetch)
    # x_ref:      VMEM (TB, S, D) gated/normalized token features input (any float dtype)
    # feat_ref:   VMEM (D, Cpad)  fused [text ; pair] features, transposed + lane-padded
    # out_ref:    VMEM (TB, Cpad) fused [lp ; pair] logits (split in wrapper)
    pad = (ksz - 1) // 2
    x = x_ref[...].astype(jnp.float32)                      # upcast after DMA (bf16 ok)
    tb, s, _ = x.shape

    # Channel statistics: lane-axis (feature) reductions.  keepdims keeps every
    # per-token scalar in one shared (TB, S, 1) layout -> no lane<->sublane relayout.
    ssq = jnp.sum(x * x, axis=-1, keepdims=True)            # (TB, S, 1)  sum_D x^2
    p = (jnp.mean(x, axis=-1, keepdims=True)
         + jnp.max(x, axis=-1, keepdims=True))              # (TB, S, 1)  avg + max pool

    # ECA shared Conv1d (bias=False): conv(avg) + conv(max) == conv(avg + max).
    # ksz-tap shifted-add on the VPU (zero padding == Conv1d(padding=pad)),
    # replacing the near-empty (S,S) MXU matmul of the previous version.
    if pad > 0:
        zp = jnp.zeros((tb, pad, 1), dtype=jnp.float32)
        pz = jnp.concatenate([zp, p, zp], axis=1)           # (TB, S + 2*pad, 1)
    else:
        pz = p
    conv = params_ref[0] * pz[:, 0:s, :]
    for t in range(1, ksz):
        conv = conv + params_ref[t] * pz[:, t:t + s, :]

    gate = jax.nn.sigmoid(conv)                             # (TB, S, 1), EUP

    # Gate and L2 norm folded into ONE per-token scale:
    #   xn = (x*g)/||x*g||_2  ==  x * [ g * rsqrt(g^2 * ssq + eps) ]
    scale = gate * jax.lax.rsqrt(gate * gate * ssq + 1e-12)  # (TB, S, 1)

    # Token sum hoisted before the similarity matmul:
    #   sum_S(xn @ F) == (sum_S xn) @ F == (sum_S x*scale) @ F
    xsum = jnp.sum(x * scale, axis=1)                        # (TB, D)

    sim = jnp.dot(xsum, feat_ref[...], preferred_element_type=jnp.float32)
    out_ref[...] = params_ref[ksz] * sim                     # (TB, Cpad), one dense write


def encode_pspglp(x_tokens, conv_w, text_features, pair_features, logit_scale_exp):
    """x_tokens: (B, S, D); text_features: (2*cls, D); pair_features: (P, D)."""
    B, S, D = x_tokens.shape
    C2 = text_features.shape[0]
    P = pair_features.shape[0]
    C2P = C2 + P
    ksz = int(conv_w.shape[0])

    # Lane-dense fused class operand/output: pad classes up to a multiple of 128.
    Cpad = ((C2P + 127) // 128) * 128
    feat = jnp.concatenate([text_features, pair_features], axis=0).astype(jnp.float32)
    feat = jnp.concatenate(
        [feat, jnp.zeros((Cpad - C2P, D), jnp.float32)], axis=0).T      # (D, Cpad)

    # Small scalar params ride in SMEM via scalar prefetch: [conv taps..., logit_scale].
    params = jnp.concatenate(
        [conv_w.astype(jnp.float32).reshape(-1),
         jnp.reshape(logit_scale_exp.astype(jnp.float32), (1,))])        # (ksz+1,)

    # Batch grid: a single step at toy B, shards across TensorCores (v7x) and
    # bounds VMEM residency once B grows.
    TB = B if B <= 8 else 8
    grid = (pl.cdiv(B, TB),)

    itemsize = jnp.dtype(x_tokens.dtype).itemsize
    cost = pl.CostEstimate(
        flops=int(2 * B * S * D * 3 + 2 * B * D * Cpad + 4 * B * S * ksz),
        transcendentals=int(2 * B * S),
        bytes_accessed=int(B * S * D * itemsize + D * Cpad * 4 + B * Cpad * 4
                           + (ksz + 1) * 4),
    )

    out = pl.pallas_call(
        functools.partial(pspglp_kernel, ksz=ksz),
        out_shape=jax.ShapeDtypeStruct((B, Cpad), jnp.float32),
        grid_spec=pltpu.PrefetchScalarGridSpec(
            num_scalar_prefetch=1,
            grid=grid,
            in_specs=[
                pl.BlockSpec((TB, S, D), lambda b, prm: (b, 0, 0)),   # tokens
                pl.BlockSpec((D, Cpad), lambda b, prm: (0, 0)),       # fused features
            ],
            out_specs=pl.BlockSpec((TB, Cpad), lambda b, prm: (b, 0)),
        ),
        compiler_params=pltpu.CompilerParams(dimension_semantics=("parallel",)),
        cost_estimate=cost,
    )(params, x_tokens, feat)

    lp = out[:, :C2]                       # (B, 2*cls)
    pr = out[:, C2:C2P]                    # (B, P)
    return lp.reshape(B, 2, C2 // 2), pr


# ---------------------------- driver ----------------------------

if __name__ == "__main__":
    key = jax.random.PRNGKey(0)
    B, S, D = 2, 50, 64          # 50 tokens (1 global + 49 patches), as ECA_combined(50)
    cls, P = 4, 4
    TEMPERATURE = 0.07

    k_img, k_conv, k_wg, k_wt, k_pos, k_neg, k_pair = jax.random.split(key, 7)

    # ECA params: channel=50 -> kernel_size=3, padding=1, bias=False
    ksz = _eca_kernel_size(S)
    pad = (ksz - 1) // 2
    conv_w = 0.3 * jax.random.normal(k_conv, (ksz,), dtype=jnp.float32)

    # logit_scale = log(1/TEMPERATURE) as in __init__; forward uses exp()
    logit_scale = jnp.asarray(np.log(1.0 / TEMPERATURE), dtype=jnp.float32)
    ls_exp = jnp.exp(logit_scale)

    # NCHW input image (what the torch module receives)
    image = jax.random.normal(k_img, (B, 3, 16, 16), dtype=jnp.float32)

    # TODO(synk): real CLIP image/text encoders + PsPG_LP prompt learner are external
    # injected modules; deterministic linear stand-ins are used to produce their outputs.
    img_flat = image.reshape(B, -1)
    W_g = 0.02 * jax.random.normal(k_wg, (img_flat.shape[1], D), dtype=jnp.float32)
    W_t = 0.02 * jax.random.normal(k_wt, (img_flat.shape[1], D * S), dtype=jnp.float32)
    attn_feature = jnp.tanh(img_flat @ W_g)                       # un-normalized global (B, D)
    channel_features = jnp.tanh(img_flat @ W_t).reshape(B, D, S)  # local tokens (B, D, S)

    # Tiny L2 normalizations of encoder outputs stay in plain JAX (XLA fuses them;
    # a custom call per 4x64 / 2x64 array would be pure launch+DMA overhead).
    def l2n(v):
        return v / jnp.linalg.norm(v, axis=-1, keepdims=True)

    # encode_image tail: x1 = x / ||x||
    image_features = l2n(attn_feature)

    # stand-in prompt learner + text encoder outputs; encode_text tail L2 norm
    pos_features = l2n(jax.random.normal(k_pos, (cls, D), dtype=jnp.float32))
    neg_features = l2n(jax.random.normal(k_neg, (cls, D), dtype=jnp.float32))
    pair_features = l2n(jax.random.normal(k_pair, (P, D), dtype=jnp.float32))
    lp_features = jnp.concatenate([pos_features, neg_features], axis=0)   # (2*cls, D)

    # encode_pspglp front glue: permute local tokens, splice normalized global at slot 0
    tokens = jnp.transpose(channel_features, (0, 2, 1))                   # (B, S, D)
    x_eca = jnp.concatenate([image_features[:, None, :], tokens[:, 1:]], axis=1)

    lp_logits, pair_logits = encode_pspglp(x_eca, conv_w, lp_features, pair_features, ls_exp)
    clip_logits = None   # eval path with PsPG_LP prompt learner -> clip_logits stays None

    jax.block_until_ready((lp_logits, pair_logits))

    # pure-JAX reference for sanity (mirrors the original torch ordering)
    def ref(x, cw, text_f, pair_f, ls):
        avg_p = jnp.mean(x, axis=-1)
        max_p = jnp.max(x, axis=-1)

        def conv1d(p):
            pz = jnp.pad(p, ((0, 0), (pad, pad)))
            out = jnp.zeros_like(p)
            for t in range(ksz):
                out = out + cw[t] * pz[:, t:t + S]
            return out

        gate = jax.nn.sigmoid(conv1d(avg_p) + conv1d(max_p))[..., None]
        xa = x * gate
        xn = xa / jnp.linalg.norm(xa, axis=-1, keepdims=True)
        lp = (ls * jnp.einsum('bsd,cd->bsc', xn, text_f)).sum(1)
        pr = (ls * jnp.einsum('bsd,pd->bsp', xn, pair_f)).sum(1)
        return lp.reshape(B, 2, -1), pr

    lp_ref, pr_ref = ref(x_eca, conv_w, lp_features, pair_features, ls_exp)
    err_lp = float(jnp.max(jnp.abs(lp_logits - lp_ref)) / (jnp.max(jnp.abs(lp_ref)) + 1e-6))
    err_pr = float(jnp.max(jnp.abs(pair_logits - pr_ref)) / (jnp.max(jnp.abs(pr_ref)) + 1e-6))
    assert err_lp < 2e-2 and err_pr < 2e-2, (err_lp, err_pr)
    assert clip_logits is None and lp_logits.shape == (B, 2, cls) and pair_logits.shape == (B, P)
    print("KERNEL_OK")
</pallas_src>

<mosaic_0001>
module attributes {stable_mosaic.version = 11 : i64} {
  func.func @pspglp_kernel(%arg0: i32, %arg1: memref<4xf32, #tpu.memory_space<smem>>, %arg2: memref<2x50x64xf32, #tpu.memory_space<vmem>>, %arg3: memref<64x128xf32, #tpu.memory_space<vmem>>, %arg4: memref<2x128xf32, #tpu.memory_space<vmem>>) attributes {dimension_semantics = [#tpu.dimension_semantics<parallel>], iteration_bounds = array<i64: 1>, scalar_prefetch = 1 : i64, scratch_operands = 0 : i64, tpu.core_type = #tpu.core_type<tc>, window_params = [{transform_indices = @transform_0, window_bounds = array<i64: 2, 50, 64>}, {pipeline_mode = #tpu.pipeline_mode<synchronous>, transform_indices = @transform_1, window_bounds = array<i64: 64, 128>}, {transform_indices = @transform_2, window_bounds = array<i64: 2, 128>}]} {
    %c0 = arith.constant 0 : index
    %c0_0 = arith.constant 0 : index
    %c0_1 = arith.constant 0 : index
    %0 = vector.load %arg2[%c0, %c0_0, %c0_1] : memref<2x50x64xf32, #tpu.memory_space<vmem>>, vector<2x50x64xf32>
    %1 = arith.mulf %0, %0 : vector<2x50x64xf32>
    %cst = arith.constant dense<0.000000e+00> : vector<2x50xf32>
    %2 = vector.multi_reduction <add>, %1, %cst [2] : vector<2x50x64xf32> to vector<2x50xf32>
    %3 = vector.shape_cast %2 : vector<2x50xf32> to vector<2x50x1xf32>
    %cst_2 = arith.constant dense<0.000000e+00> : vector<2x50xf32>
    %4 = vector.multi_reduction <add>, %0, %cst_2 [2] : vector<2x50x64xf32> to vector<2x50xf32>
    %5 = vector.shape_cast %4 : vector<2x50xf32> to vector<2x50x1xf32>
    %cst_3 = arith.constant 6.400000e+01 : f32
    %6 = vector.broadcast %cst_3 : f32 to vector<2x50x1xf32>
    %7 = arith.divf %5, %6 : vector<2x50x1xf32>
    %cst_4 = arith.constant dense<0xFF800000> : vector<2x50xf32>
    %8 = vector.multi_reduction <maximumf>, %0, %cst_4 [2] : vector<2x50x64xf32> to vector<2x50xf32>
    %9 = vector.shape_cast %8 : vector<2x50xf32> to vector<2x50x1xf32>
    %10 = arith.addf %7, %9 : vector<2x50x1xf32>
    %cst_5 = arith.constant 0.000000e+00 : f32
    %11 = vector.broadcast %cst_5 : f32 to vector<2x1x1xf32>
    %12 = tpu.concatenate %11, %10, %11 in 1 : vector<2x1x1xf32>, vector<2x50x1xf32>, vector<2x1x1xf32> -> vector<2x52x1xf32>
    %c0_6 = arith.constant 0 : index
    %13 = memref.load %arg1[%c0_6] : memref<4xf32, #tpu.memory_space<smem>>
    %14 = vector.extract_strided_slice %12 {offsets = [0, 0, 0], sizes = [2, 50, 1], strides = [1, 1, 1]} : vector<2x52x1xf32> to vector<2x50x1xf32>
    %15 = vector.broadcast %13 : f32 to vector<2x50x1xf32>
    %16 = arith.mulf %15, %14 : vector<2x50x1xf32>
    %c1 = arith.constant 1 : index
    %17 = memref.load %arg1[%c1] : memref<4xf32, #tpu.memory_space<smem>>
    %18 = vector.extract_strided_slice %12 {offsets = [0, 1, 0], sizes = [2, 50, 1], strides = [1, 1, 1]} : vector<2x52x1xf32> to vector<2x50x1xf32>
    %19 = vector.broadcast %17 : f32 to vector<2x50x1xf32>
    %20 = arith.mulf %19, %18 : vector<2x50x1xf32>
    %21 = arith.addf %16, %20 : vector<2x50x1xf32>
    %c2 = arith.constant 2 : index
    %22 = memref.load %arg1[%c2] : memref<4xf32, #tpu.memory_space<smem>>
    %23 = vector.extract_strided_slice %12 {offsets = [0, 2, 0], sizes = [2, 50, 1], strides = [1, 1, 1]} : vector<2x52x1xf32> to vector<2x50x1xf32>
    %24 = vector.broadcast %22 : f32 to vector<2x50x1xf32>
    %25 = arith.mulf %24, %23 : vector<2x50x1xf32>
    %26 = arith.addf %21, %25 : vector<2x50x1xf32>
    %27 = arith.negf %26 : vector<2x50x1xf32>
    %28 = math.exp %27 : vector<2x50x1xf32>
    %cst_7 = arith.constant 1.000000e+00 : f32
    %29 = vector.broadcast %cst_7 : f32 to vector<2x50x1xf32>
    %30 = arith.addf %29, %28 : vector<2x50x1xf32>
    %31 = arith.divf %29, %30 : vector<2x50x1xf32>
    %32 = arith.mulf %31, %31 : vector<2x50x1xf32>
    %33 = arith.mulf %32, %3 : vector<2x50x1xf32>
    %cst_8 = arith.constant 9.99999996E-13 : f32
    %34 = vector.broadcast %cst_8 : f32 to vector<2x50x1xf32>
    %35 = arith.addf %33, %34 : vector<2x50x1xf32>
    %36 = math.rsqrt %35 : vector<2x50x1xf32>
    %37 = arith.mulf %31, %36 : vector<2x50x1xf32>
    %38 = vector.broadcast %37 : vector<2x50x1xf32> to vector<2x50x64xf32>
    %39 = arith.mulf %0, %38 : vector<2x50x64xf32>
    %cst_9 = arith.constant dense<0.000000e+00> : vector<2x64xf32>
    %40 = vector.multi_reduction <add>, %39, %cst_9 [1] : vector<2x50x64xf32> to vector<2x64xf32>
    %c0_10 = arith.constant 0 : index
    %c0_11 = arith.constant 0 : index
    %41 = vector.load %arg3[%c0_10, %c0_11] : memref<64x128xf32, #tpu.memory_space<vmem>>, vector<64x128xf32>
    %cst_12 = arith.constant dense<0.000000e+00> : vector<2x128xf32>
    %42 = tpu.matmul %40, %41, %cst_12 {dimension_numbers = #tpu.dot_dimension_numbers<[1], [0], [0], [1], [0, 0, 1, 1], [], []>} : vector<2x64xf32>, vector<64x128xf32>, vector<2x128xf32> -> vector<2x128xf32>
    %c3 = arith.constant 3 : index
    %43 = memref.load %arg1[%c3] : memref<4xf32, #tpu.memory_space<smem>>
    %44 = vector.broadcast %43 : f32 to vector<2x128xf32>
    %45 = arith.mulf %44, %42 : vector<2x128xf32>
    %c0_13 = arith.constant 0 : index
    %c0_14 = arith.constant 0 : index
    %46 = vector.load %arg4[%c0_13, %c0_14] : memref<2x128xf32, #tpu.memory_space<vmem>>, vector<2x128xf32>
    tpu.vector_store %arg4[%c0_13, %c0_14], %45 {strides = array<i32>} : memref<2x128xf32, #tpu.memory_space<vmem>>, vector<2x128xf32>,
    return
  }
  func.func @transform_0(%arg0: i32, %arg1: memref<4xf32, #tpu.memory_space<smem>>) -> (i32, i32, i32) {
    %c0_i32 = arith.constant 0 : i32
    %c0_i32_0 = arith.constant 0 : i32
    %c0_i32_1 = arith.constant 0 : i32
    return %arg0, %c0_i32, %c0_i32_0 : i32, i32, i32
  }
  func.func @transform_1(%arg0: i32, %arg1: memref<4xf32, #tpu.memory_space<smem>>) -> (i32, i32) {
    %c0_i32 = arith.constant 0 : i32
    %c0_i32_0 = arith.constant 0 : i32
    %c0_i32_1 = arith.constant 0 : i32
    return %c0_i32, %c0_i32_0 : i32, i32
  }
  func.func @transform_2(%arg0: i32, %arg1: memref<4xf32, #tpu.memory_space<smem>>) -> (i32, i32) {
    %c0_i32 = arith.constant 0 : i32
    %c0_i32_0 = arith.constant 0 : i32
    return %arg0, %c0_i32 : i32, i32
  }
}

</mosaic_0001>

<bundles_post_ra>
// kernel: tpu_custom_call.1
= control target key start
LH: loop header
LB: loop body
LE: loop exit
PB: predicated region body
PF: predicated region fallthrough
CT: control target
= control target key end

     0   :  { %s1456_s0 = inlined_call_operand.vmem [shape: f32[4], index: 0, kind: input, shape index: {}]   ;;  %s1457_s1 = inlined_call_operand.vmem [shape: f32[2,50,64], index: 1, kind: input, shape index: {}]   ;;  %s1458_s2 = inlined_call_operand.vmem [shape: f32[64,128], index: 2, kind: input, shape index: {}]   ;;  %s1459_s3 = inlined_call_operand.hbm [shape: f32[2,128], index: 3, kind: output, shape index: {}]  }
   0x1   :  { %s8_s14 = sshll.u32 %s1456_s0, 4  ;;  %s9_s14 = int_to_ptr.vmem [resolvable:$true] %s8_s14 }
   0x2   :  { %s992_s15 = scalar_lea.vmem %s9_s14, 16  ;;  %p997_p1 = scmp.lt.s32.totalorder %s9_s14, %s9_s14 }
   0x3   :  { %p993_p0 = scmp.ne.s32.totalorder %s9_s14, %s992_s15  ;;  %p998_p2 = scmp.lt.s32.totalorder %s992_s15, %s992_s15 }
   0x5   :  { %p999_p3 = por %p998_p2, %p997_p1 }
   0x7   :  { %p1000_p4 = pnand %p999_p3, %p993_p0 }
   0x9   :  { %1003 = shalt.err (!%p1000_p4)  }
   0xa   :  { %s1030_s16 = smov [#allocation3]  }
   0xb   :  { %11 = dma.vmem_to_smem %s9_s14, 16, %s1030_s16, [#allocation2] }
   0xc   :  { %1026 = dma.done.wait [#allocation2], 16 }
   0xd   :  { %1027 = vsyncadd [#allocation2], 4294967280 }
   0xe   :  { %13 = sfence }
   0xf   :  { %v1062_v0 = vld [vmem:[%s1457_s1 + $0x10] sm:$0xff]  ;;  %vm47_vm0 = vcmask 523264   ;;  %v1067_v1 = vld [vmem:[%s1457_s1] sm:$0xff]  ;;  %v1072_v2 = vld [vmem:[%s1457_s1 + $0x38] sm:$0xff] }
  0x10   :  { %v97_v3 = vsel %vm47_vm0, %v1062_v0, 0.0  ;;  %v91_v4 = vsel %vm47_vm0, %v1067_v1, 0.0  ;;  %v1081_v5 = vld [vmem:[%s1457_s1 + $0x8] sm:$0xff]  ;;  %v112_v6 = vsel %vm47_vm0, %v1072_v2, 0.0  ;;  %v1095_v9 = vld [vmem:[%s1457_s1 + $0x40] sm:$0xff] }
  0x11   :  { %98 = vadd.xlane.f32.xlu1 %v97_v3  ;;  %92 = vadd.xlane.f32.xlu0 %v91_v4  ;;  %v94_v7 = vsel %vm47_vm0, %v1081_v5, 0.0  ;;  %v1090_v8 = vld [vmem:[%s1457_s1 + $0x48] sm:$0xff]  ;;  %v115_v11 = vsel %vm47_vm0, %v1095_v9, 0.0 }
  0x12   :  { %v118_v10 = vsel %vm47_vm0, %v1090_v8, 0.0 }
  0x15   :  { %113 = vadd.xlane.f32.xlu1 %v112_v6  ;;  %95 = vadd.xlane.f32.xlu0 %v94_v7 }
  0x16   :  { %14 = vsyncpa [#allocation5], 0  ;;  %v1104_v12 = vld [vmem:[%s1457_s1 + $0x50] sm:$0xff]  ;;  %v1109_v13 = vld [vmem:[%s1457_s1 + $0x18] sm:$0xff]  ;;  %v151_v16 = vsel %vm47_vm0, %v1081_v5, -inf  ;;  %v148_v17 = vsel %vm47_vm0, %v1067_v1, -inf  ;;  %v33_v42 = vmul.f32 %v1067_v1, %v1067_v1  ;;  %v34_v43 = vmul.f32 %v1081_v5, %v1081_v5 }
  0x17   :  { %v121_v14 = vsel %vm47_vm0, %v1104_v12, 0.0  ;;  %v100_v15 = vsel %vm47_vm0, %v1109_v13, 0.0  ;;  %v169_v18 = vsel %vm47_vm0, %v1072_v2, -inf  ;;  %v154_v19 = vsel %vm47_vm0, %v1062_v0, -inf  ;;  %v30_v22 = vld [vmem:[%s1457_s1 + $0x58] sm:$0xff]  ;;  %v23_v23 = vld [vmem:[%s1457_s1 + $0x20] sm:$0xff] }
  0x18   :  { %v175_v20 = vsel %vm47_vm0, %v1090_v8, -inf  ;;  %v172_v21 = vsel %vm47_vm0, %v1095_v9, -inf  ;;  %v124_v24 = vsel %vm47_vm0, %v30_v22, 0.0  ;;  %v103_v25 = vsel %vm47_vm0, %v23_v23, 0.0  ;;  %v31_v28 = vld [vmem:[%s1457_s1 + $0x60] sm:$0xff]  ;;  %v24_v29 = vld [vmem:[%s1457_s1 + $0x28] sm:$0xff] }
  0x19   :  { %119 = vadd.xlane.f32.xlu1 %v118_v10  ;;  %116 = vadd.xlane.f32.xlu0 %v115_v11  ;;  %v178_v26 = vsel %vm47_vm0, %v1104_v12, -inf  ;;  %v157_v27 = vsel %vm47_vm0, %v1109_v13, -inf  ;;  %v127_v30 = vsel %vm47_vm0, %v31_v28, 0.0  ;;  %v106_v31 = vsel %vm47_vm0, %v24_v29, 0.0  ;;  %v32_v34 = vld [vmem:[%s1457_s1 + $0x68] sm:$0x3] }
  0x1a   :  { %v181_v32 = vsel %vm47_vm0, %v30_v22, -inf  ;;  %v160_v33 = vsel %vm47_vm0, %v23_v23, -inf  ;;  %vm66_vm1 = vcmask 517120   ;;  %v25_v35 = vld [vmem:[%s1457_s1 + $0x30] sm:$0x3]  ;;  %v184_v38 = vsel %vm47_vm0, %v31_v28, -inf }
  0x1b   :  { %v130_v36 = vsel %vm66_vm1, %v32_v34, 0.0  ;;  %v109_v37 = vsel %vm66_vm1, %v25_v35, 0.0  ;;  %v163_v39 = vsel %vm47_vm0, %v24_v29, -inf  ;;  %v187_v40 = vsel %vm66_vm1, %v32_v34, -inf  ;;  %s828_s17 = sld [smem:[#allocation3 + $0x1]]  ;;  %s264_s18 = sld [smem:[#allocation3]] }
  0x1c   :  { %v166_v41 = vsel %vm66_vm1, %v25_v35, -inf  ;;  %v48_v44 = vsel %vm47_vm0, %v33_v42, 0.0  ;;  %v51_v45 = vsel %vm47_vm0, %v34_v43, 0.0  ;;  %v41_v46 = vmul.f32 %v1095_v9, %v1095_v9  ;;  %s829_s0 = sld [smem:[#allocation3 + $0x2]]  ;;  %s1035_s7 = smov [#allocation4]  }
  0x1d   :  { %122 = vadd.xlane.f32.xlu1 %v121_v14  ;;  %101 = vadd.xlane.f32.xlu0 %v100_v15  ;;  %v40_v47 = vmul.f32 %v1072_v2, %v1072_v2  ;;  %v42_v50 = vmul.f32 %v1090_v8, %v1090_v8  ;;  %v35_v51 = vmul.f32 %v1062_v0, %v1062_v0  ;;  %v1031_v6 = vmov 0   ;;  %s820_s8 = sshll.u32 %s1035_s7, 4  ;;  %s821_s8 = int_to_ptr.vmem [resolvable:$true] %s820_s8 }
  0x1e   :  { %v73_v48 = vsel %vm47_vm0, %v41_v46, 0.0  ;;  %v43_v54 = vmul.f32 %v1104_v12, %v1104_v12  ;;  %v36_v55 = vmul.f32 %v1109_v13, %v1109_v13  ;;  %v44_v58 = vmul.f32 %v30_v22, %v30_v22  ;;  %892 = vset.pattern.permute.xlu0 %v1031_v6  ;;  %893 = vset.pattern.permute.xlu1 %v1031_v6  ;;  %s1004_s9 = scalar_lea.vmem %s821_s8, 32  ;;  %p1009_p6 = scmp.lt.s32.totalorder %s821_s8, %s821_s8 }
  0x1f   :  { %v70_v49 = vsel %vm47_vm0, %v40_v47, 0.0  ;;  %v76_v52 = vsel %vm47_vm0, %v42_v50, 0.0  ;;  %v54_v53 = vsel %vm47_vm0, %v35_v51, 0.0  ;;  %v37_v59 = vmul.f32 %v23_v23, %v23_v23  ;;  %p1005_p5 = scmp.ne.s32.totalorder %s821_s8, %s1004_s9  ;;  %p1010_p7 = scmp.lt.s32.totalorder %s1004_s9, %s1004_s9 }
  0x20   :  { %v79_v56 = vsel %vm47_vm0, %v43_v54, 0.0  ;;  %v57_v57 = vsel %vm47_vm0, %v36_v55, 0.0  ;;  %v82_v60 = vsel %vm47_vm0, %v44_v58, 0.0  ;;  %v45_v62 = vmul.f32 %v31_v28, %v31_v28 }
  0x21   :  { %152 = vmax.xlane.f32.xlu1 %v151_v16  ;;  %149 = vmax.xlane.f32.xlu0 %v148_v17  ;;  %v60_v61 = vsel %vm47_vm0, %v37_v59, 0.0  ;;  %v38_v63 = vmul.f32 %v24_v29, %v24_v29  ;;  %v46_v2 = vmul.f32 %v32_v34, %v32_v34  ;;  %v39_v3 = vmul.f32 %v25_v35, %v25_v35  ;;  %p1011_p8 = por %p1010_p7, %p1009_p6 }
  0x22   :  { %v85_v0 = vsel %vm47_vm0, %v45_v62, 0.0  ;;  %vm218_vm2 = vcmask 1040384   ;;  %vm310_vm3 = vcmask 1046528   ;;  %vm395_vm4 = vcmask 1045504  }
  0x23   :  { %v63_v1 = vsel %vm47_vm0, %v38_v63, 0.0  ;;  %v88_v4 = vsel %vm66_vm1, %v46_v2, 0.0  ;;  %v67_v5 = vsel %vm66_vm1, %v39_v3, 0.0  ;;  %vm261_vm5 = vcmask 1042432   ;;  %p1012_p9 = pnand %p1011_p8, %p1005_p5 }
  0x24   :  { %vm1033_vm6 = vmmov 0   ;;  %vm736_vm7 = vcmask 1041409  }
  0x25   :  { %170 = vmax.xlane.f32.xlu1 %v169_v18  ;;  %155 = vmax.xlane.f32.xlu0 %v154_v19 }
  0x29   :  { %176 = vmax.xlane.f32.xlu1 %v175_v20  ;;  %173 = vmax.xlane.f32.xlu0 %v172_v21  ;;  %v1191_v21 = vstv %s828_s17 }
  0x2d   :  { %125 = vadd.xlane.f32.xlu1 %v124_v24  ;;  %104 = vadd.xlane.f32.xlu0 %v103_v25 }
  0x31   :  { %179 = vmax.xlane.f32.xlu1 %v178_v26  ;;  %158 = vmax.xlane.f32.xlu0 %v157_v27  ;;  %v1193_v26 = vstv %s264_s18  ;;  %v1195_v27 = vstv %s829_s0 }
  0x35   :  { %128 = vadd.xlane.f32.xlu1 %v127_v30  ;;  %107 = vadd.xlane.f32.xlu0 %v106_v31 }
  0x39   :  { %182 = vmax.xlane.f32.xlu1 %v181_v32  ;;  %161 = vmax.xlane.f32.xlu0 %v160_v33 }
  0x3d   :  { %131 = vadd.xlane.f32.xlu1 %v130_v36  ;;  %110 = vadd.xlane.f32.xlu0 %v109_v37 }
  0x41   :  { %185 = vmax.xlane.f32.xlu1 %v184_v38  ;;  %164 = vmax.xlane.f32.xlu0 %v163_v39 }
  0x45   :  { %188 = vmax.xlane.f32.xlu1 %v187_v40  ;;  %167 = vmax.xlane.f32.xlu0 %v166_v41 }
  0x49   :  { %49 = vadd.xlane.f32.xlu0 %v48_v44  ;;  %52 = vadd.xlane.f32.xlu1 %v51_v45 }
  0x4d   :  { %74 = vadd.xlane.f32.xlu1 %v73_v48  ;;  %71 = vadd.xlane.f32.xlu0 %v70_v49 }
  0x51   :  { %77 = vadd.xlane.f32.xlu1 %v76_v52  ;;  %55 = vadd.xlane.f32.xlu0 %v54_v53 }
  0x55   :  { %80 = vadd.xlane.f32.xlu1 %v79_v56  ;;  %58 = vadd.xlane.f32.xlu0 %v57_v57 }
  0x59   :  { %83 = vadd.xlane.f32.xlu1 %v82_v60  ;;  %61 = vadd.xlane.f32.xlu0 %v60_v61 }
  0x5d   :  { %86 = vadd.xlane.f32.xlu1 %v85_v0  ;;  %64 = vadd.xlane.f32.xlu0 %v63_v1 }
  0x61   :  { %89 = vadd.xlane.f32.xlu1 %v88_v4  ;;  %68 = vadd.xlane.f32.xlu0 %v67_v5 }
  0x9e   :  { %v99_v7 = vpop.xlane.xlu1 %98  ;;  %v93_v8 = vpop.xlane.xlu0 %92 }
  0x9f   :  { %v134_v15 = vmul.f32 0.015625, %v93_v8  ;;  %v136_v22 = vmul.f32 0.015625, %v99_v7 }
  0xa2   :  { %v114_v9 = vpop.xlane.xlu1 %113  ;;  %v96_v10 = vpop.xlane.xlu0 %95 }
  0xa3   :  { %v135_v16 = vmul.f32 0.015625, %v96_v10  ;;  %v141_v23 = vmul.f32 0.015625, %v114_v9 }
  0xa6   :  { %v120_v11 = vpop.xlane.xlu1 %119  ;;  %v117_v12 = vpop.xlane.xlu0 %116 }
  0xa7   :  { %v143_v49 = vmul.f32 0.015625, %v120_v11  ;;  %v142_v50 = vmul.f32 0.015625, %v117_v12 }
  0xaa   :  { %v123_v13 = vpop.xlane.xlu1 %122  ;;  %v102_v14 = vpop.xlane.xlu0 %101 }
  0xab   :  { %v144_v52 = vmul.f32 0.015625, %v123_v13  ;;  %v137_v62 = vmul.f32 0.015625, %v102_v14 }
  0xae   :  { %v153_v17 = vpop.xlane.xlu1 %152  ;;  %v150_v18 = vpop.xlane.xlu0 %149 }
  0xaf   :  { %v191_v19 = vadd.f32 %v153_v17, %v135_v16  ;;  %v190_v20 = vadd.f32 %v150_v18, %v134_v15 }
  0xb1   :  { %v220_v24 = vrot.slane %v191_v19, 7  ;;  %v219_v25 = vrot.slane %v190_v20, 7 }
  0xb2   :  { %v171_v28 = vpop.xlane.xlu1 %170  ;;  %v156_v29 = vpop.xlane.xlu0 %155 }
  0xb3   :  { %v221_v30 = vsel %vm218_vm2, %v219_v25, %v220_v24  ;;  %v259_v31 = vsel %vm218_vm2, 0.0, %v219_v25  ;;  %v197_v32 = vadd.f32 %v171_v28, %v141_v23  ;;  %v1199_v33 = vadd.f32 %v156_v29, %v136_v22 }
  0xb4   :  { %v282_v34 = vmul.f32 %v1191_v21, %v259_v31  ;;  %v283_v35 = vmul.f32 %v1191_v21, %v221_v30  ;;  %v367_v36 = vmul.f32 %v1195_v27, %v259_v31  ;;  %v368_v37 = vmul.f32 %v1195_v27, %v221_v30 }
  0xb5   :  { %v232_v38 = vrot.slane %v197_v32, 7  ;;  %v222_v39 = vrot.slane %v1199_v33, 7  ;;  %v266_v40 = vmul.f32 %v1193_v26, %v259_v31  ;;  %v267_v2 = vmul.f32 %v1193_v26, %v221_v30 }
  0xb6   :  { %v311_v41 = vrot.slane %v282_v34, 1  ;;  %v312_v42 = vrot.slane %v283_v35, 1  ;;  %v177_v43 = vpop.xlane.xlu1 %176  ;;  %v174_v44 = vpop.xlane.xlu0 %173  ;;  %v396_v45 = vrot.slane %v367_v36, 2  ;;  %v397_v46 = vrot.slane %v368_v37, 2 }
  0xb7   :  { %v260_v47 = vsel %vm218_vm2, 0.0, %v232_v38  ;;  %v223_v48 = vsel %vm218_vm2, %v220_v24, %v222_v39  ;;  %v199_v59 = vadd.f32 %v177_v43, %v143_v49  ;;  %v198_v1 = vadd.f32 %v174_v44, %v142_v50 }
  0xb8   :  { %v313_v51 = vsel %vm310_vm3, %v311_v41, %v312_v42  ;;  %v289_v54 = vmul.f32 %v1191_v21, %v260_v47  ;;  %v1214_v55 = vmul.f32 %v1191_v21, %v223_v48  ;;  %v398_v56 = vsel %vm395_vm4, %v396_v45, %v397_v46 }
  0xb9   :  { %v351_v53 = vadd.f32 %v313_v51, %v266_v40  ;;  %v374_v57 = vmul.f32 %v1195_v27, %v260_v47  ;;  %v1219_v58 = vmul.f32 %v1195_v27, %v223_v48  ;;  %v273_v3 = vmul.f32 %v1193_v26, %v260_v47 }
  0xba   :  { %v126_v60 = vpop.xlane.xlu1 %125  ;;  %v105_v61 = vpop.xlane.xlu0 %104  ;;  %v314_v0 = vrot.slane %v1214_v55, 1  ;;  %v235_v5 = vrot.slane %v199_v59, 7  ;;  %v1226_v7 = vmul.f32 %v1193_v26, %v223_v48  ;;  %v233_v9 = vrot.slane %v198_v1, 7 }
  0xbb   :  { %v436_v63 = vadd.f32 %v398_v56, %v351_v53  ;;  %v399_v4 = vrot.slane %v1219_v58, 2  ;;  %v324_v10 = vrot.slane %v289_v54, 1  ;;  %v409_v11 = vrot.slane %v374_v57, 2 }
  0xbc   :  { %v315_v8 = vsel %vm310_vm3, %v312_v42, %v314_v0  ;;  %v234_v16 = vsel %vm218_vm2, %v232_v38, %v233_v9  ;;  %v236_v17 = vsel %vm218_vm2, %v233_v9, %v235_v5  ;;  %v145_v22 = vmul.f32 0.015625, %v126_v60 }
  0xbd   :  { %v830_v6 = vmul.f32 -1.442695, %v436_v63  ;;  %v352_v12 = vadd.f32 %v315_v8, %v267_v2  ;;  %v400_v13 = vsel %vm395_vm4, %v397_v46, %v399_v4  ;;  %v290_v20 = vmul.f32 %v1191_v21, %v234_v16 }
  0xbe   :  { %v180_v14 = vpop.xlane.xlu1 %179  ;;  %v159_v15 = vpop.xlane.xlu0 %158  ;;  %v138_v23 = vmul.f32 0.015625, %v105_v61  ;;  %v291_v24 = vmul.f32 %v1191_v21, %v236_v17  ;;  %v375_v25 = vmul.f32 %v1195_v27, %v234_v16  ;;  %v376_v28 = vmul.f32 %v1195_v27, %v236_v17 }
  0xbf   :  { %894 = vpow2.f32 %v830_v6  ;;  %v1236_v18 = vadd.f32 %v180_v14, %v144_v52  ;;  %v437_v19 = vadd.f32 %v400_v13, %v352_v12  ;;  %v274_v31 = vmul.f32 %v1193_v26, %v234_v16 }
  0xc0   :  { %v325_v32 = vrot.slane %v290_v20, 1  ;;  %v1244_v34 = vadd.f32 %v159_v15, %v137_v62  ;;  %v327_v37 = vrot.slane %v291_v24, 1  ;;  %v410_v38 = vrot.slane %v375_v25, 2 }
  0xc1   :  { %v237_v29 = vrot.slane %v1236_v18, 7  ;;  %v831_v30 = vmul.f32 -1.442695, %v437_v19  ;;  %v412_v40 = vrot.slane %v376_v28, 2  ;;  %v275_v42 = vmul.f32 %v1193_v26, %v236_v17 }
  0xc2   :  { %v129_v35 = vpop.xlane.xlu1 %128  ;;  %v108_v36 = vpop.xlane.xlu0 %107  ;;  %v326_v43 = vsel %vm310_vm3, %v324_v10, %v325_v32  ;;  %v328_v45 = vsel %vm310_vm3, %v325_v32, %v327_v37  ;;  %v411_v47 = vsel %vm395_vm4, %v409_v11, %v410_v38  ;;  %v224_v52 = vrot.slane %v1244_v34, 7 }
  0xc3   :  { %v238_v41 = vsel %vm218_vm2, %v235_v5, %v237_v29  ;;  %896 = vpow2.f32 %v831_v30  ;;  %v358_v46 = vadd.f32 %v326_v43, %v273_v3  ;;  %v359_v49 = vadd.f32 %v328_v45, %v274_v31 }
  0xc4   :  { %v1250_v44 = vmul.f32 %v1191_v21, %v238_v41  ;;  %v276_v48 = vmul.f32 %v1193_v26, %v238_v41  ;;  %v1257_v51 = vmul.f32 %v1195_v27, %v238_v41  ;;  %v413_v56 = vsel %vm395_vm4, %v410_v38, %v412_v40 }
  0xc5   :  { %v443_v57 = vadd.f32 %v411_v47, %v358_v46  ;;  %v146_v59 = vmul.f32 0.015625, %v129_v35  ;;  %v444_v61 = vadd.f32 %v413_v56, %v359_v49  ;;  %v225_v1 = vsel %vm218_vm2, %v222_v39, %v224_v52 }
  0xc6   :  { %v329_v50 = vrot.slane %v1250_v44, 1  ;;  %v183_v53 = vpop.xlane.xlu1 %182  ;;  %v162_v54 = vpop.xlane.xlu0 %161  ;;  %v414_v63 = vrot.slane %v1257_v51, 2  ;;  %v285_v6 = vmul.f32 %v1191_v21, %v225_v1  ;;  %v139_v8 = vmul.f32 0.015625, %v108_v36 }
  0xc7   :  { %v201_v60 = vadd.f32 %v183_v53, %v145_v22  ;;  %v837_v3 = vmul.f32 -1.442695, %v443_v57  ;;  %v838_v9 = vmul.f32 -1.442695, %v444_v61  ;;  %v269_v11 = vmul.f32 %v1193_v26, %v225_v1 }
  0xc8   :  { %v330_v62 = vsel %vm310_vm3, %v327_v37, %v329_v50  ;;  %v415_v10 = vsel %vm395_vm4, %v412_v40, %v414_v63  ;;  %v370_v12 = vmul.f32 %v1195_v27, %v225_v1  ;;  %v316_v33 = vrot.slane %v285_v6, 1 }
  0xc9   :  { %v895_v2 = vpop.eup %894  ;;  %v360_v5 = vadd.f32 %v330_v62, %v275_v42  ;;  %898 = vpow2.f32 %v837_v3  ;;  %v239_v16 = vrot.slane %v201_v60, 7  ;;  %v194_v18 = vadd.f32 %v162_v54, %v138_v23 }
  0xca   :  { %v132_v13 = vpop.xlane.xlu1 %131  ;;  %v111_v14 = vpop.xlane.xlu0 %110  ;;  %v492_v39 = vadd.f32 1.0, %v895_v2  ;;  %900 = vpow2.f32 %v838_v9  ;;  %v401_v17 = vrot.slane %v370_v12, 2  ;;  %v317_v20 = vsel %vm310_vm3, %v314_v0, %v316_v33 }
  0xcb   :  { %v445_v15 = vadd.f32 %v415_v10, %v360_v5  ;;  %v240_v22 = vsel %vm218_vm2, %v237_v29, %v239_v16  ;;  %v147_v24 = vmul.f32 0.015625, %v132_v13  ;;  %v353_v28 = vadd.f32 %v317_v20, %v1226_v7 }
  0xcc   :  { %v402_v30 = vsel %vm395_vm4, %v399_v4, %v401_v17  ;;  %v293_v31 = vmul.f32 %v1191_v21, %v240_v22  ;;  %v140_v32 = vmul.f32 0.015625, %v111_v14  ;;  %v277_v35 = vmul.f32 %v1193_v26, %v240_v22 }
  0xcd   :  { %v839_v19 = vmul.f32 -1.442695, %v445_v15  ;;  %v897_v25 = vpop.eup %896  ;;  %v378_v55 = vmul.f32 %v1195_v27, %v240_v22  ;;  %v226_v0 = vrot.slane %v194_v18, 7  ;;  %v438_v29 = vadd.f32 %v402_v30, %v353_v28 }
  0xce   :  { %v186_v34 = vpop.xlane.xlu1 %185  ;;  %v165_v23 = vpop.xlane.xlu0 %164  ;;  %v331_v37 = vrot.slane %v293_v31, 1  ;;  %v1284_v43 = vadd.f32 1.0, %v897_v25 }
  0xcf   :  { %v202_v36 = vadd.f32 %v186_v34, %v146_v59  ;;  %902 = vpow2.f32 %v839_v19  ;;  %v195_v38 = vadd.f32 %v165_v23, %v139_v8  ;;  %v416_v7 = vrot.slane %v378_v55, 2 }
  0xd0   :  { %v227_v58 = vsel %vm218_vm2, %v224_v52, %v226_v0  ;;  %904 = vrcp.f32 %v492_v39  ;;  %v832_v40 = vmul.f32 -1.442695, %v438_v29  ;;  %v332_v41 = vsel %vm310_vm3, %v329_v50, %v331_v37 }
  0xd1   :  { %v241_v4 = vrot.slane %v202_v36, 7  ;;  %v286_v42 = vmul.f32 %v1191_v21, %v227_v58  ;;  %v361_v44 = vadd.f32 %v332_v41, %v276_v48  ;;  %v270_v45 = vmul.f32 %v1193_v26, %v227_v58 }
  0xd2   :  { %v371_v46 = vmul.f32 %v1195_v27, %v227_v58  ;;  %v189_v49 = vpop.xlane.xlu1 %188  ;;  %v168_v51 = vpop.xlane.xlu0 %167  ;;  %906 = vpow2.f32 %v832_v40  ;;  %v417_v52 = vsel %vm395_vm4, %v414_v63, %v416_v7  ;;  %v228_v59 = vrot.slane %v195_v38, 7 }
  0xd3   :  { %v242_v47 = vsel %vm218_vm2, %v239_v16, %v241_v4  ;;  %v318_v53 = vrot.slane %v286_v42, 1  ;;  %v1291_v50 = vpop.eup %898  ;;  %v446_v56 = vadd.f32 %v417_v52, %v361_v44  ;;  %v203_v1 = vadd.f32 %v189_v49, %v147_v24 }
  0xd4   :  { %v294_v54 = vmul.f32 %v1191_v21, %v242_v47  ;;  %v403_v57 = vrot.slane %v371_v46, 2  ;;  %v379_v48 = vmul.f32 %v1195_v27, %v242_v47  ;;  %v1294_v60 = vpop.eup %900  ;;  %v196_v2 = vadd.f32 %v168_v51, %v140_v32 }
  0xd5   :  { %v319_v61 = vsel %vm310_vm3, %v316_v33, %v318_v53  ;;  %v278_v5 = vmul.f32 %v1193_v26, %v242_v47  ;;  %v229_v9 = vsel %vm218_vm2, %v226_v0, %v228_v59  ;;  %v243_v10 = vrot.slane %v203_v1, 7 }
  0xd6   :  { %v333_v62 = vrot.slane %v294_v54, 1  ;;  %v354_v3 = vadd.f32 %v319_v61, %v269_v11  ;;  %v404_v63 = vsel %vm395_vm4, %v401_v17, %v403_v57  ;;  %v418_v6 = vrot.slane %v379_v48, 2  ;;  %v53_v40 = vpop.xlane.xlu1 %52 }
  0xd7   :  { %v230_v12 = vrot.slane %v196_v2, 7  ;;  %v840_v13 = vmul.f32 -1.442695, %v446_v56  ;;  %v271_v11 = vmul.f32 %v1193_v26, %v229_v9  ;;  %v287_v39 = vmul.f32 %v1191_v21, %v229_v9 }
  0xd8   :  { %v334_v8 = vsel %vm310_vm3, %v331_v37, %v333_v62  ;;  %v439_v14 = vadd.f32 %v404_v63, %v354_v3  ;;  %v419_v33 = vsel %vm395_vm4, %v416_v7, %v418_v6  ;;  %v372_v17 = vmul.f32 %v1195_v27, %v229_v9 }
  0xd9   :  { %v362_v15 = vadd.f32 %v334_v8, %v277_v35  ;;  %v1302_v16 = vpop.eup %902  ;;  %v244_v18 = vsel %vm218_vm2, %v241_v4, %v243_v10  ;;  %v231_v25 = vsel %vm218_vm2, %v228_v59, %v230_v12  ;;  %v320_v28 = vrot.slane %v287_v39, 1  ;;  %v50_v4 = vpop.xlane.xlu0 %49 }
  0xda   :  { %v1308_v19 = vpop.eup %904  ;;  %v833_v20 = vmul.f32 -1.442695, %v439_v14  ;;  %v263_v24 = vsel %vm261_vm5, %v244_v18, 0.0  ;;  %v405_v30 = vrot.slane %v372_v17, 2  ;;  %v262_v35 = vsel %vm261_vm5, %v231_v25, 0.0  ;;  %v75_v1 = vpop.xlane.xlu1 %74 }
  0xdb   :  { %v447_v22 = vadd.f32 %v419_v33, %v362_v15  ;;  %v279_v31 = vmul.f32 %v1193_v26, %v263_v24  ;;  %v295_v32 = vmul.f32 %v1191_v21, %v263_v24  ;;  %v380_v23 = vmul.f32 %v1195_v27, %v263_v24 }
  0xdc   :  { %908 = vpow2.f32 %v833_v20  ;;  %v907_v55 = vpop.eup %906  ;;  %v321_v0 = vsel %vm310_vm3, %v318_v53, %v320_v28  ;;  %v406_v36 = vsel %vm395_vm4, %v403_v57, %v405_v30  ;;  %v272_v37 = vmul.f32 %v1193_v26, %v262_v35 }
  0xdd   :  { %v841_v34 = vmul.f32 -1.442695, %v447_v22  ;;  %v335_v29 = vrot.slane %v295_v32, 1  ;;  %v355_v38 = vadd.f32 %v321_v0, %v270_v45  ;;  %v420_v7 = vrot.slane %v380_v23, 2 }
  0xde   :  { %v288_v58 = vmul.f32 %v1191_v21, %v262_v35  ;;  %v373_v44 = vmul.f32 %v1195_v27, %v262_v35  ;;  %v534_v46 = vmul.f32 %v1308_v19, %v1308_v19  ;;  %v1330_v9 = vpop.xlane.xlu1 %77  ;;  %v501_v10 = vadd.f32 1.0, %v1302_v16 }
  0xdf   :  { %910 = vpow2.f32 %v841_v34  ;;  %v336_v41 = vsel %vm310_vm3, %v333_v62, %v335_v29  ;;  %v364_v42 = vadd.f32 %v335_v29, %v279_v31  ;;  %v440_v47 = vadd.f32 %v406_v36, %v355_v38  ;;  %v72_v34 = vpop.xlane.xlu0 %71 }
  0xe0   :  { %v363_v49 = vadd.f32 %v336_v41, %v278_v5  ;;  %v421_v51 = vsel %vm395_vm4, %v418_v6, %v420_v7  ;;  %v322_v26 = vrot.slane %v288_v58, 1  ;;  %v407_v45 = vrot.slane %v373_v44, 2 }
  0xe1   :  { %v449_v52 = vadd.f32 %v420_v7, %v364_v42  ;;  %v548_v53 = vmul.f32 %v534_v46, %v50_v4  ;;  %912 = vrcp.f32 %v1284_v43  ;;  %v834_v21 = vmul.f32 -1.442695, %v440_v47 }
  0xe2   :  { %v448_v54 = vadd.f32 %v421_v51, %v363_v49  ;;  %v323_v56 = vsel %vm310_vm3, %v320_v28, %v322_v26  ;;  %v357_v57 = vadd.f32 %v322_v26, %v272_v37  ;;  %914 = vpow2.f32 %v840_v13 }
  0xe3   :  { %v843_v27 = vmul.f32 -1.442695, %v449_v52  ;;  %v356_v48 = vadd.f32 %v323_v56, %v271_v11  ;;  %v562_v59 = vadd.f32 1e-12, %v548_v53  ;;  %916 = vpow2.f32 %v834_v21  ;;  %v1333_v11 = vpop.xlane.xlu1 %80  ;;  %v56_v38 = vpop.xlane.xlu0 %55 }
  0xe4   :  { %v842_v61 = vmul.f32 -1.442695, %v448_v54  ;;  %v408_v62 = vsel %vm395_vm4, %v405_v30, %v407_v45  ;;  %v442_v63 = vadd.f32 %v407_v45, %v357_v57  ;;  %v500_v43 = vadd.f32 1.0, %v1294_v60 }
  0xe5   :  { %918 = vpow2.f32 %v843_v27  ;;  %v441_v2 = vadd.f32 %v408_v62, %v356_v48  ;;  %v499_v6 = vadd.f32 1.0, %v1291_v50  ;;  %v494_v12 = vadd.f32 1.0, %v907_v55 }
  0xe6   :  { %v909_v3 = vpop.eup %908  ;;  %920 = vpow2.f32 %v842_v61  ;;  %v836_v13 = vmul.f32 -1.442695, %v442_v63 }
  0xe7   :  { %v835_v5 = vmul.f32 -1.442695, %v441_v2  ;;  %922 = vrsqrt.f32 %v562_v59  ;;  %v495_v15 = vadd.f32 1.0, %v909_v3  ;;  %v84_v31 = vpop.xlane.xlu1 %83  ;;  %v59_v57 = vpop.xlane.xlu0 %58 }
  0xe9   :  { %v911_v8 = vpop.eup %910  ;;  %924 = vpow2.f32 %v835_v5 }
  0xea   :  { %926 = vrcp.f32 %v500_v43  ;;  %v503_v60 = vadd.f32 1.0, %v911_v8 }
  0xeb   :  { %v913_v14 = vpop.eup %912  ;;  %928 = vrcp.f32 %v499_v6  ;;  %v87_v41 = vpop.xlane.xlu1 %86 }
  0xec   :  { %v535_v33 = vmul.f32 %v913_v14, %v913_v14  ;;  %930 = vrcp.f32 %v501_v10  ;;  %v915_v39 = vpop.eup %914 }
  0xed   :  { %932 = vrcp.f32 %v494_v12  ;;  %v917_v50 = vpop.eup %916  ;;  %v502_v25 = vadd.f32 1.0, %v915_v39 }
  0xee   :  { %934 = vpow2.f32 %v836_v13  ;;  %v549_v17 = vmul.f32 %v535_v33, %v53_v40  ;;  %v496_v23 = vadd.f32 1.0, %v917_v50 }
  0xef   :  { %v919_v18 = vpop.eup %918  ;;  %936 = vrcp.f32 %v495_v15  ;;  %v90_v62 = vpop.xlane.xlu1 %89 }
  0xf0   :  { %v921_v16 = vpop.eup %920  ;;  %v563_v20 = vadd.f32 1e-12, %v549_v17  ;;  %938 = vrcp.f32 %v503_v60  ;;  %v505_v22 = vadd.f32 1.0, %v919_v18 }
  0xf1   :  { %v923_v24 = vpop.eup %922  ;;  %v504_v28 = vadd.f32 1.0, %v921_v16 }
  0xf2   :  { %940 = vrsqrt.f32 %v563_v20  ;;  %v590_v30 = vmul.f32 %v923_v24, %v1308_v19 }
  0xf3   :  { %v925_v32 = vpop.eup %924  ;;  %942 = vrcp.f32 %v504_v28 }
  0xf4   :  { %v1336_v35 = vpop.eup %926  ;;  %606 = vperm.xlu0 %892, %v590_v30   ;;  %944 = vrcp.f32 %v505_v22  ;;  %v497_v7 = vadd.f32 1.0, %v925_v32 }
  0xf5   :  { %v929_v55 = vpop.eup %928  ;;  %v542_v0 = vmul.f32 %v1336_v35, %v1336_v35  ;;  %946 = vrcp.f32 %v502_v25 }
  0xf6   :  { %v1340_v36 = vpop.eup %930  ;;  %v541_v29 = vmul.f32 %v929_v55, %v929_v55  ;;  %948 = vrcp.f32 %v496_v23 }
  0xf7   :  { %v1342_v37 = vpop.eup %932  ;;  %v556_v19 = vmul.f32 %v542_v0, %v75_v1  ;;  %v543_v49 = vmul.f32 %v1340_v36, %v1340_v36  ;;  %950 = vrcp.f32 %v497_v7 }
  0xf8   :  { %v935_v58 = vpop.eup %934  ;;  %v555_v4 = vmul.f32 %v541_v29, %v72_v34  ;;  %v536_v40 = vmul.f32 %v1342_v37, %v1342_v37 }
  0xf9   :  { %v1346_v42 = vpop.eup %936  ;;  %v570_v46 = vadd.f32 1e-12, %v556_v19  ;;  %v498_v52 = vadd.f32 1.0, %v935_v58  ;;  %v557_v59 = vmul.f32 %v543_v49, %v1330_v9  ;;  %v62_v9 = vpop.xlane.xlu0 %61 }
  0xfa   :  { %v939_v44 = vpop.eup %938  ;;  %v569_v47 = vadd.f32 1e-12, %v555_v4  ;;  %v550_v51 = vmul.f32 %v536_v40, %v56_v38  ;;  %v537_v21 = vmul.f32 %v1346_v42, %v1346_v42 }
  0xfb   :  { %v545_v26 = vmul.f32 %v939_v44, %v939_v44  ;;  %v571_v8 = vadd.f32 1e-12, %v557_v59 }
  0xfc   :  { %v941_v45 = vpop.eup %940  ;;  %952 = vrsqrt.f32 %v569_v47  ;;  %v564_v53 = vadd.f32 1e-12, %v550_v51  ;;  %v551_v63 = vmul.f32 %v537_v21, %v59_v57  ;;  %v1032_v21 = vmov 0.0|0.0  }
  0xfd   :  { %v943_v54 = vpop.eup %942  ;;  %v591_v56 = vmul.f32 %v941_v45, %v913_v14  ;;  %v559_v27 = vmul.f32 %v545_v26, %v84_v31  ;;  %954 = vrsqrt.f32 %v570_v46  ;;  %v65_v22 = vpop.xlane.xlu0 %64  ;;  %v727_v45 = vld [vmem:[%s1458_s2 + $0x8] sm:$0xff]  ;;  %874 = vmatprep.subr.bf16.mxu0 %v1032_v21 }
  0xfe   :  { %v945_v48 = vpop.eup %944  ;;  %v546_v61 = vmul.f32 %v943_v54, %v943_v54  ;;  %956 = vrcp.f32 %v498_v52  ;;  %v565_v14 = vadd.f32 1e-12, %v551_v63 }
  0xff   :  { %v1353_v1 = vpop.eup %946  ;;  %611 = vperm.xlu1 %893, %v591_v56   ;;  %v573_v2 = vadd.f32 1e-12, %v559_v27  ;;  %v547_v3 = vmul.f32 %v945_v48, %v945_v48  ;;  %958 = vrsqrt.f32 %v564_v53  ;;  %v729_v56 = vld [vmem:[%s1458_s2 + $0x18] sm:$0xff]  ;;  %v730_v27 = vld [vmem:[%s1458_s2 + $0x20] sm:$0xff] }
 0x100   :  { %v560_v43 = vmul.f32 %v546_v61, %v87_v41  ;;  %v949_v5 = vpop.eup %948  ;;  %v544_v10 = vmul.f32 %v1353_v1, %v1353_v1  ;;  %v732_v61 = vld [vmem:[%s1458_s2 + $0x30] sm:$0xff] }
 0x101   :  { %960 = vrsqrt.f32 %v573_v2  ;;  %v561_v6 = vmul.f32 %v547_v3, %v90_v62  ;;  %v538_v15 = vmul.f32 %v949_v5, %v949_v5  ;;  %v951_v33 = vpop.eup %950  ;;  %v69_v0 = vpop.xlane.xlu0 %68  ;;  %v733_v62 = vld [vmem:[%s1458_s2 + $0x38] sm:$0xff]  ;;  %v1034_v2 = vmov 0.0  }
 0x102   :  { %v574_v12 = vadd.f32 1e-12, %v560_v43  ;;  %v558_v39 = vmul.f32 %v544_v10, %v1333_v11  ;;  %v539_v16 = vmul.f32 %v951_v33, %v951_v33  ;;  %871 = vmatprep.mubr.msk.f32.mxu0 %vm1033_vm6, %v1034_v2 }
 0x103   :  { %v575_v13 = vadd.f32 1e-12, %v561_v6  ;;  %v552_v18 = vmul.f32 %v538_v15, %v62_v9 }
 0x104   :  { %962 = vrsqrt.f32 %v574_v12  ;;  %v572_v25 = vadd.f32 1e-12, %v558_v39  ;;  %v553_v32 = vmul.f32 %v539_v16, %v65_v22  ;;  %v978_v12 = vld [vmem:[%s1457_s1 + $0x40] sm:$0xff]  ;;  %v982_v22 = vld [vmem:[%s1457_s1 + $0x58] sm:$0xff] }
 0x105   :  { %964 = vrsqrt.f32 %v571_v8  ;;  %v566_v31 = vadd.f32 1e-12, %v552_v18 }
 0x106   :  { %v953_v60 = vpop.eup %952  ;;  %966 = vrsqrt.f32 %v575_v13  ;;  %v567_v38 = vadd.f32 1e-12, %v553_v32 }
 0x107   :  { %v597_v50 = vmul.f32 %v953_v60, %v929_v55  ;;  %v955_v17 = vpop.eup %954  ;;  %968 = vrsqrt.f32 %v565_v14  ;;  %v979_v14 = vld [vmem:[%s1457_s1 + $0x38] sm:$0xff] }
 0x108   :  { %v957_v20 = vpop.eup %956  ;;  %v598_v30 = vmul.f32 %v955_v17, %v1336_v35  ;;  %970 = vrsqrt.f32 %v572_v25  ;;  %v981_v17 = vld [vmem:[%s1457_s1 + $0x8] sm:$0xff] }
 0x109   :  { %641 = vperm.xlu1 %893, %v597_v50   ;;  %v959_v24 = vpop.eup %958  ;;  %v540_v55 = vmul.f32 %v957_v20, %v957_v20  ;;  %972 = vrsqrt.f32 %v566_v31  ;;  %v983_v31 = vld [vmem:[%s1457_s1] sm:$0xff] }
 0x10a   :  { %v592_v11 = vmul.f32 %v959_v24, %v1342_v37  ;;  %974 = vrsqrt.f32 %v567_v38 }
 0x10b   :  { %v961_v28 = vpop.eup %960  ;;  %v554_v4 = vmul.f32 %v540_v55, %v69_v0  ;;  %v986_v0 = vld [vmem:[%s1457_s1 + $0x60] sm:$0xff] }
 0x10c   :  { %v601_v34 = vmul.f32 %v961_v28, %v939_v44 }
 0x10d   :  { %646 = vperm.xlu1 %893, %v598_v30   ;;  %v568_v41 = vadd.f32 1e-12, %v554_v4 }
 0x10e   :  { %v963_v23 = vpop.eup %962  ;;  %661 = vperm.xlu0 %892, %v601_v34   ;;  %v984_v34 = vld [vmem:[%s1457_s1 + $0x10] sm:$0xff] }
 0x10f   :  { %v602_v29 = vmul.f32 %v963_v23, %v943_v54  ;;  %v965_v19 = vpop.eup %964  ;;  %976 = vrsqrt.f32 %v568_v41  ;;  %v728_v54 = vld [vmem:[%s1458_s2 + $0x10] sm:$0xff] }
 0x110   :  { %v967_v7 = vpop.eup %966  ;;  %v599_v35 = vmul.f32 %v965_v19, %v1340_v36  ;;  %v878_v57 = vpack.c.bf16 %v729_v56, %v728_v54  ;;  %v985_v23 = vld [vmem:[%s1457_s1 + $0x50] sm:$0xff] }
 0x111   :  { %616 = vperm.xlu1 %893, %v592_v11   ;;  %v969_v58 = vpop.eup %968  ;;  %v603_v40 = vmul.f32 %v967_v7, %v945_v48  ;;  %v731_v48 = vld [vmem:[%s1458_s2 + $0x28] sm:$0xff]  ;;  %v987_v7 = vld [vmem:[%s1457_s1 + $0x18] sm:$0xff] }
 0x112   :  { %666 = vperm.xlu0 %892, %v602_v29   ;;  %v593_v37 = vmul.f32 %v969_v58, %v1346_v42  ;;  %v971_v44 = vpop.eup %970  ;;  %v726_v42 = vld [vmem:[%s1458_s2] sm:$0xff]  ;;  %v881_v59 = vpack.c.bf16 %v731_v48, %v730_v27 }
 0x113   :  { %v973_v46 = vpop.eup %972  ;;  %v600_v47 = vmul.f32 %v971_v44, %v1353_v1  ;;  %v875_v53 = vpack.c.bf16 %v727_v45, %v726_v42  ;;  %v884_v1 = vpack.c.bf16 %v733_v62, %v732_v61 }
 0x114   :  { %v594_v49 = vmul.f32 %v973_v46, %v949_v5  ;;  %v975_v51 = vpop.eup %974 }
 0x115   :  { %651 = vperm.xlu1 %893, %v599_v35   ;;  %v595_v26 = vmul.f32 %v975_v51, %v951_v33  ;;  %876 = vmatpush3.bf16.msra.mxu0 %v875_v53  ;;  %v980_v33 = vld [vmem:[%s1457_s1 + $0x48] sm:$0xff] }
 0x116   :  { %671 = vperm.xlu0 %892, %v603_v40   ;;  %877 = vmatprep.subr.bf16.mxu0 %v1032_v21  ;;  %v988_v40 = vld [vmem:[%s1457_s1 + $0x68] sm:$0x3] }
 0x119   :  { %621 = vperm.xlu1 %893, %v593_v37   ;;  %v977_v52 = vpop.eup %976  ;;  %879 = vmatpush3.bf16.msra.mxu0 %v878_v57  ;;  %v990_v57 = vld [vmem:[%s1457_s1 + $0x28] sm:$0xff] }
 0x11a   :  { %v596_v36 = vmul.f32 %v977_v52, %v957_v20  ;;  %880 = vmatprep.subr.bf16.mxu0 %v1032_v21 }
 0x11d   :  { %656 = vperm.xlu1 %893, %v600_v47   ;;  %882 = vmatpush3.bf16.msra.mxu0 %v881_v59 }
 0x11e   :  { %883 = vmatprep.subr.bf16.mxu0 %v1032_v21 }
 0x121   :  { %626 = vperm.xlu1 %893, %v594_v49   ;;  %885 = vmatpush3.bf16.msra.mxu0 %v884_v1  ;;  %v989_v49 = vld [vmem:[%s1457_s1 + $0x20] sm:$0xff] }
 0x125   :  { %631 = vperm.xlu1 %893, %v595_v26  }
 0x129   :  { %636 = vperm.xlu1 %893, %v596_v36  }
 0x173   :  { %v607_v43 = vpop.permute.xlu0 %606 }
 0x174   :  { %v674_v32 = vmul.f32 %v983_v31, %v607_v43 }
 0x176   :  { %v688_v46 = vsel %vm47_vm0, %v674_v32, 0.0 }
 0x17e   :  { %v612_v3 = vpop.permute.xlu1 %611 }
 0x17f   :  { %v675_v18 = vmul.f32 %v981_v17, %v612_v3  ;;  %v991_v3 = vld [vmem:[%s1457_s1 + $0x30] sm:$0x3]  ;;  %s845_s1 = sld [smem:[#allocation3 + $0x3]] }
 0x181   :  { %v689_v19 = vsel %vm47_vm0, %v675_v18, 0.0 }
 0x182   :  { %v690_v52 = vadd.f32 %v689_v19, %v688_v46 }
 0x185   :  { %v811_v18 = vstv %s845_s1 }
 0x188   :  { %v642_v63 = vpop.permute.xlu1 %641 }
 0x189   :  { %v681_v15 = vmul.f32 %v979_v14, %v642_v63 }
 0x18b   :  { %v707_v16 = vsel %vm47_vm0, %v681_v15, 0.0 }
 0x18c   :  { %v647_v5 = vpop.permute.xlu1 %646 }
 0x18d   :  { %v662_v8 = vpop.permute.xlu0 %661  ;;  %v682_v9 = vmul.f32 %v978_v12, %v647_v5 }
 0x18e   :  { %v685_v24 = vmul.f32 %v982_v22, %v662_v8 }
 0x18f   :  { %v708_v50 = vsel %vm47_vm0, %v682_v9, 0.0 }
 0x190   :  { %v617_v6 = vpop.permute.xlu1 %616  ;;  %v709_v25 = vadd.f32 %v708_v50, %v707_v16  ;;  %v714_v35 = vsel %vm47_vm0, %v685_v24, 0.0 }
 0x191   :  { %v667_v13 = vpop.permute.xlu0 %666  ;;  %v676_v11 = vmul.f32 %v984_v34, %v617_v6 }
 0x192   :  { %v686_v29 = vmul.f32 %v986_v0, %v667_v13 }
 0x193   :  { %v691_v47 = vsel %vm47_vm0, %v676_v11, 0.0 }
 0x194   :  { %v652_v10 = vpop.permute.xlu1 %651  ;;  %v716_v26 = vsel %vm47_vm0, %v686_v29, 0.0  ;;  %v692_v53 = vadd.f32 %v691_v47, %v690_v52 }
 0x195   :  { %v683_v60 = vmul.f32 %v980_v33, %v652_v10  ;;  %v672_v30 = vpop.permute.xlu0 %671 }
 0x196   :  { %v687_v37 = vmul.f32 %v988_v40, %v672_v30 }
 0x197   :  { %v710_v20 = vsel %vm47_vm0, %v683_v60, 0.0 }
 0x198   :  { %v622_v39 = vpop.permute.xlu1 %621  ;;  %v711_v38 = vadd.f32 %v710_v20, %v709_v25  ;;  %v718_v45 = vsel %vm66_vm1, %v687_v37, 0.0 }
 0x199   :  { %v677_v58 = vmul.f32 %v987_v7, %v622_v39 }
 0x19b   :  { %v693_v42 = vsel %vm47_vm0, %v677_v58, 0.0 }
 0x19c   :  { %v657_v28 = vpop.permute.xlu1 %656  ;;  %v694_v48 = vadd.f32 %v693_v42, %v692_v53 }
 0x19d   :  { %v684_v55 = vmul.f32 %v985_v23, %v657_v28 }
 0x19f   :  { %v712_v4 = vsel %vm47_vm0, %v684_v55, 0.0 }
 0x1a0   :  { %v713_v41 = vadd.f32 %v712_v4, %v711_v38  ;;  %v627_v44 = vpop.permute.xlu1 %626 }
 0x1a1   :  { %v678_v51 = vmul.f32 %v989_v49, %v627_v44 }
 0x1a2   :  { %v715_v36 = vadd.f32 %v714_v35, %v713_v41 }
 0x1a3   :  { %v695_v56 = vsel %vm47_vm0, %v678_v51, 0.0 }
 0x1a4   :  { %v632_v21 = vpop.permute.xlu1 %631  ;;  %v717_v54 = vadd.f32 %v716_v26, %v715_v36  ;;  %v696_v62 = vadd.f32 %v695_v56, %v694_v48 }
 0x1a5   :  { %v679_v27 = vmul.f32 %v990_v57, %v632_v21 }
 0x1a6   :  { %v719_v59 = vadd.f32 %v718_v45, %v717_v54 }
 0x1a7   :  { %v697_v61 = vsel %vm47_vm0, %v679_v27, 0.0 }
 0x1a8   :  { %v637_v1 = vpop.permute.xlu1 %636  ;;  %v720_v2 = vrot.slane %v719_v59, 4  ;;  %v698_v43 = vadd.f32 %v697_v61, %v696_v62 }
 0x1a9   :  { %v680_v63 = vmul.f32 %v991_v3, %v637_v1 }
 0x1aa   :  { %v721_v5 = vadd.f32 %v720_v2, %v719_v59 }
 0x1ab   :  { %v699_v6 = vsel %vm66_vm1, %v680_v63, 0.0 }
 0x1ac   :  { %v700_v8 = vadd.f32 %v699_v6, %v698_v43  ;;  %v722_v10 = vrot.slane %v721_v5, 2 }
 0x1ae   :  { %v701_v12 = vrot.slane %v700_v8, 4  ;;  %v723_v9 = vadd.f32 %v722_v10, %v721_v5 }
 0x1b0   :  { %v702_v13 = vadd.f32 %v701_v12, %v700_v8  ;;  %v724_v15 = vrot.slane %v723_v9, 1 }
 0x1b2   :  { %v703_v14 = vrot.slane %v702_v13, 2  ;;  %v725_v39 = vadd.f32 %v724_v15, %v723_v9 }
 0x1b4   :  { %v704_v33 = vadd.f32 %v703_v14, %v702_v13 }
 0x1b6   :  { %v705_v60 = vrot.slane %v704_v33, 1 }
 0x1b8   :  { %v706_v50 = vadd.f32 %v705_v60, %v704_v33 }
 0x1ba   :  { %v737_v17 = vsel %vm736_vm7, %v725_v39, %v706_v50 }
 0x1bb   :  { %872 = vmatmul.mubr.msk.f32.vlgmr.msra.gmra.mrb[0].mxu0 %vm47_vm0, %v737_v17 }
 0x28e   :  { %v806_v16 = vpop.f32.mrb[0].mxu0 }
 0x28f   :  { %v812_v20 = vmul.f32 %v811_v18, %v806_v16  ;;  %v873_v22 = vpop.f32.mrb[1].mxu0 }
 0x291   :  { %813 = vst [vmem:[#allocation4] sm:$0x3] %v812_v20 }
 0x292   :  { %1015 = shalt.err (!%p1012_p9)
}
 0x293   :  { %s1016_s11 = scalar_lea.hbm %s1459_s3, 32 }
 0x294   :  { %p1017_p10 = scmp.ne.s32.totalorder %s1459_s3, %s1016_s11  ;;  %p1020_p11 = scmp.lt.u32.totalorder %s1016_s11, %s1459_s3 }
 0x296   :  { %p1022_p12 = pnand %p1020_p11, %p1017_p10 }
 0x298   :  { %1025 = shalt.err (!%p1022_p12)
}
 0x299   :  { %823 = dma.vmem_to_hbm [thread:$0]  %s821_s8, 32, %s1459_s3, [#allocation5]  }
 0x29a   :  { %1028 = dma.done.wait [#allocation5], 32  }
 0x29b   :  { %1029 = vsyncadd [#allocation5], 4294967264 }
 0x29c   :  { %827 = vsyncpa [#allocation5], 1 }

</bundles_post_ra>
